<compile_context>
chip_gen: v7x
topology: tpu7x:2x2x1
jax: 0.10.0
libtpu: 0.0.40
codegen_flags: <defaults>
</compile_context>

<pallas_src>
import jax
import jax.numpy as jnp
from jax.experimental import pallas as pl
from jax.experimental.pallas import tpu as pltpu

LANE = 128                    # lane width (last dim of every block)
SUBLANES = 8                  # sublane granularity
TARGET_BLOCK_BYTES = 4 << 20  # ~4 MiB per input block (dtype-aware row count)
SMALL_INPUT_BYTES = 1 << 20   # below this, plain JAX beats kernel overhead


def _round_up(v: int, m: int) -> int:
    return ((v + m - 1) // m) * m


def _make_mse_kernel(rows: int, tile_rows: int):
    """Accumulate sum((x - t)^2) into an (8, 128) VMEM partial, reduce once."""
    ragged = (rows % tile_rows) != 0

    def partial_sum(dd):
        # Fold over sublane groups -> (8, LANE). Leading-axis reduction is pure
        # vreg-wise VPU adds (no cross-lane work).
        return jnp.sum(dd.reshape(-1, SUBLANES, LANE), axis=0)

    def mse_kernel(x_ref, t_ref, o_ref, acc_ref):
        i = pl.program_id(0)
        last = pl.num_programs(0) - 1

        @pl.when(i == 0)
        def _():
            acc_ref[...] = jnp.zeros_like(acc_ref)

        d = x_ref[...].astype(jnp.float32) - t_ref[...].astype(jnp.float32)

        if ragged:
            # Fast path: fully in-bounds interior blocks, no mask work.
            @pl.when(i != last)
            def _():
                acc_ref[...] += partial_sum(d * d)

            # Masked path: only the final (partial) block. The OOB tail of the
            # boundary DMA is unspecified; the select keeps it out of the sum.
            @pl.when(i == last)
            def _():
                valid = rows - i * tile_rows
                row_ids = jax.lax.broadcasted_iota(
                    jnp.int32, (tile_rows, LANE), 0)
                dd = jnp.where(row_ids < valid, d * d, 0.0)
                acc_ref[...] += partial_sum(dd)
        else:
            acc_ref[...] += partial_sum(d * d)

        @pl.when(i == last)
        def _():
            # Single cross-lane (XLU) reduction, once per kernel.
            o_ref[0, 0] = jnp.sum(acc_ref[...])

    return mse_kernel


def content_loss(x: jax.Array, target: jax.Array, *,
                 force_pallas: bool = False) -> jax.Array:
    """Pallas equivalent of F.mse_loss(x, target) (mean reduction)."""
    assert x.shape == target.shape, "input/target shape mismatch"
    n = x.size
    out_dtype = jnp.result_type(x, target)
    itemsize = jnp.dtype(x.dtype).itemsize

    if not force_pallas and n * itemsize < SMALL_INPUT_BYTES:
        # Small-input fallback: fixed pallas_call overhead dominates here.
        d = x.astype(jnp.float32) - target.astype(jnp.float32)
        return (jnp.sum(d * d) / jnp.float32(n)).astype(out_dtype)

    # Lane-dense view: (rows, 128).
    pad = (-n) % LANE
    rows = (n + pad) // LANE

    # Dtype-aware block sizing: target ~4 MiB per input block, rows a multiple
    # of the sublane count.
    max_rows = max(SUBLANES,
                   (TARGET_BLOCK_BYTES // (LANE * itemsize)) // SUBLANES * SUBLANES)

    if rows <= max_rows:
        # Single block: round rows up to a sublane multiple so the block shape
        # matches the (padded) array exactly -- no ragged tail, no mask.
        rows_padded = _round_up(rows, SUBLANES)
        tile_rows = rows_padded
    else:
        rows_padded = rows
        tile_rows = max_rows

    # Pad only when needed; padded positions are zero in BOTH arrays and
    # therefore contribute 0 to the sum. (For large arrays this only triggers
    # when n is not a multiple of 128.)
    total_pad = rows_padded * LANE - n
    xf = x.reshape(-1)
    tf = target.reshape(-1)
    if total_pad:
        xf = jnp.pad(xf, (0, total_pad))
        tf = jnp.pad(tf, (0, total_pad))
    rows = rows_padded

    x2 = xf.reshape(rows, LANE)
    t2 = tf.reshape(rows, LANE)
    num_blocks = pl.cdiv(rows, tile_rows)

    # 2 inputs x 2 pipeline buffers x block + small accumulator + margin.
    block_bytes = tile_rows * LANE * itemsize
    vmem_limit = int(min(48 << 20, 4 * block_bytes + (4 << 20)))

    total = pl.pallas_call(
        _make_mse_kernel(rows, tile_rows),
        out_shape=jax.ShapeDtypeStruct((1, 1), jnp.float32),
        grid=(num_blocks,),
        in_specs=[
            pl.BlockSpec((tile_rows, LANE), lambda i: (i, 0)),
            pl.BlockSpec((tile_rows, LANE), lambda i: (i, 0)),
        ],
        out_specs=pl.BlockSpec((1, 1), lambda i: (0, 0),
                               memory_space=pltpu.MemorySpace.SMEM),
        scratch_shapes=[pltpu.VMEM((SUBLANES, LANE), jnp.float32)],
        compiler_params=pltpu.CompilerParams(
            dimension_semantics=("arbitrary",),
            vmem_limit_bytes=vmem_limit,
        ),
        cost_estimate=pl.CostEstimate(
            flops=3 * n,
            transcendentals=0,
            bytes_accessed=int(x2.size * itemsize
                               + t2.size * jnp.dtype(target.dtype).itemsize + 4),
        ),
    )(x2, t2)

    return (total[0, 0] / jnp.float32(n)).astype(out_dtype)


class ContentLoss:
    """Mirrors the PyTorch module: target is fixed ("detached") at init."""

    def __init__(self, target: jax.Array):
        self.target = jax.lax.stop_gradient(target)

    def __call__(self, x: jax.Array, *, force_pallas: bool = False) -> jax.Array:
        return content_loss(x, self.target, force_pallas=force_pallas)


if __name__ == "__main__":
    key = jax.random.PRNGKey(0)
    k1, k2, k3, k4 = jax.random.split(key, 4)

    # Small NCHW shapes consistent with a conv-feature-map content loss.
    N, C, H, W = 2, 4, 16, 16
    x = jax.random.normal(k1, (N, C, H, W), dtype=jnp.float32)
    target = jax.random.normal(k2, (N, C, H, W), dtype=jnp.float32)

    module = ContentLoss(target)
    ref = jnp.mean((x - target) ** 2)

    # Pallas-kernel path (forced; inputs this small default to the fallback).
    loss = jax.block_until_ready(module(x, force_pallas=True))
    assert jnp.allclose(loss, ref, rtol=1e-5, atol=1e-6), (loss, ref)

    # Small-input fallback path must agree as well.
    loss_fb = jax.block_until_ready(module(x))
    assert jnp.allclose(loss_fb, ref, rtol=1e-5, atol=1e-6), (loss_fb, ref)

    # Ragged case (element count not a multiple of 128) exercises the pad path.
    xr = jax.random.normal(k3, (3, 5, 7, 11), dtype=jnp.float32)
    tr = jax.random.normal(k4, (3, 5, 7, 11), dtype=jnp.float32)
    loss_r = jax.block_until_ready(content_loss(xr, tr, force_pallas=True))
    ref_r = jnp.mean((xr - tr) ** 2)
    assert jnp.allclose(loss_r, ref_r, rtol=1e-5, atol=1e-6), (loss_r, ref_r)

    print("KERNEL_OK")
</pallas_src>

<mosaic_0001>
module attributes {stable_mosaic.version = 11 : i64} {
  func.func @mse_kernel(%arg0: i32, %arg1: memref<16x128xf32, #tpu.memory_space<vmem>>, %arg2: memref<16x128xf32, #tpu.memory_space<vmem>>, %arg3: memref<1x1xf32, #tpu.memory_space<smem>>, %arg4: memref<8x128xf32, #tpu.memory_space<vmem>>) attributes {dimension_semantics = [#tpu.dimension_semantics<arbitrary>], iteration_bounds = array<i64: 1>, scalar_prefetch = 0 : i64, scratch_operands = 1 : i64, tpu.core_type = #tpu.core_type<tc>, window_params = [{transform_indices = @transform_0, window_bounds = array<i64: 16, 128>}, {transform_indices = @transform_1, window_bounds = array<i64: 16, 128>}, {transform_indices = @transform_2, window_bounds = array<i64: 1, 1>}]} {
    %c0_i32 = arith.constant 0 : i32
    %0 = arith.cmpi eq, %arg0, %c0_i32 : i32
    %1 = arith.extui %0 : i1 to i32
    %c0_i32_0 = arith.constant 0 : i32
    %2 = arith.cmpi ne, %1, %c0_i32_0 : i32
    scf.if %2 {
      %cst_10 = arith.constant 0.000000e+00 : f32
      %15 = vector.broadcast %cst_10 : f32 to vector<8x128xf32>
      %c0_11 = arith.constant 0 : index
      %c0_12 = arith.constant 0 : index
      %16 = vector.load %arg4[%c0_11, %c0_12] : memref<8x128xf32, #tpu.memory_space<vmem>>, vector<8x128xf32>
      tpu.vector_store %arg4[%c0_11, %c0_12], %15 {strides = array<i32>} : memref<8x128xf32, #tpu.memory_space<vmem>>, vector<8x128xf32>,
    } else {
    }
    %c0 = arith.constant 0 : index
    %c0_1 = arith.constant 0 : index
    %3 = vector.load %arg1[%c0, %c0_1] : memref<16x128xf32, #tpu.memory_space<vmem>>, vector<16x128xf32>
    %c0_2 = arith.constant 0 : index
    %c0_3 = arith.constant 0 : index
    %4 = vector.load %arg2[%c0_2, %c0_3] : memref<16x128xf32, #tpu.memory_space<vmem>>, vector<16x128xf32>
    %5 = arith.subf %3, %4 : vector<16x128xf32>
    %c0_4 = arith.constant 0 : index
    %c0_5 = arith.constant 0 : index
    %6 = vector.load %arg4[%c0_4, %c0_5] : memref<8x128xf32, #tpu.memory_space<vmem>>, vector<8x128xf32>
    %7 = arith.mulf %5, %5 : vector<16x128xf32>
    %8 = vector.shape_cast %7 : vector<16x128xf32> to vector<2x8x128xf32>
    %cst = arith.constant dense<0.000000e+00> : vector<8x128xf32>
    %9 = vector.multi_reduction <add>, %8, %cst [0] : vector<2x8x128xf32> to vector<8x128xf32>
    %10 = arith.addf %6, %9 : vector<8x128xf32>
    %c0_6 = arith.constant 0 : index
    %c0_7 = arith.constant 0 : index
    %11 = vector.load %arg4[%c0_6, %c0_7] : memref<8x128xf32, #tpu.memory_space<vmem>>, vector<8x128xf32>
    tpu.vector_store %arg4[%c0_6, %c0_7], %10 {strides = array<i32>} : memref<8x128xf32, #tpu.memory_space<vmem>>, vector<8x128xf32>,
    %c0_i32_8 = arith.constant 0 : i32
    %12 = arith.cmpi eq, %arg0, %c0_i32_8 : i32
    %13 = arith.extui %12 : i1 to i32
    %c0_i32_9 = arith.constant 0 : i32
    %14 = arith.cmpi ne, %13, %c0_i32_9 : i32
    scf.if %14 {
      %c0_10 = arith.constant 0 : index
      %c0_11 = arith.constant 0 : index
      %15 = vector.load %arg4[%c0_10, %c0_11] : memref<8x128xf32, #tpu.memory_space<vmem>>, vector<8x128xf32>
      %16 = vector.shape_cast %15 : vector<8x128xf32> to vector<1x8x128xf32>
      %cst_12 = arith.constant dense<0.000000e+00> : vector<1xf32>
      %17 = vector.multi_reduction <add>, %16, %cst_12 [1, 2] : vector<1x8x128xf32> to vector<1xf32>
      %18 = vector.shape_cast %17 : vector<1xf32> to vector<1x1x1xf32>
      %19 = vector.extract %18[0, 0, 0] : f32 from vector<1x1x1xf32>
      %c0_13 = arith.constant 0 : index
      %c0_14 = arith.constant 0 : index
      %20 = memref.load %arg3[%c0_13, %c0_14] : memref<1x1xf32, #tpu.memory_space<smem>>
      memref.store %19, %arg3[%c0_13, %c0_14] : memref<1x1xf32, #tpu.memory_space<smem>>
    } else {
    }
    return
  }
  func.func @transform_0(%arg0: i32) -> (i32, i32) {
    %c0_i32 = arith.constant 0 : i32
    %c0_i32_0 = arith.constant 0 : i32
    return %arg0, %c0_i32 : i32, i32
  }
  func.func @transform_1(%arg0: i32) -> (i32, i32) {
    %c0_i32 = arith.constant 0 : i32
    %c0_i32_0 = arith.constant 0 : i32
    return %arg0, %c0_i32 : i32, i32
  }
  func.func @transform_2(%arg0: i32) -> (i32, i32) {
    %c0_i32 = arith.constant 0 : i32
    %c0_i32_0 = arith.constant 0 : i32
    %c0_i32_1 = arith.constant 0 : i32
    return %c0_i32, %c0_i32_0 : i32, i32
  }
}

</mosaic_0001>

<bundles_post_ra>
// kernel: tpu_custom_call.1
= control target key start
LH: loop header
LB: loop body
LE: loop exit
PB: predicated region body
PF: predicated region fallthrough
CT: control target
= control target key end

     0   :  { %7 = vsyncpa [#allocation4], 0  ;;  %s210_s0 = inlined_call_operand.hbm [shape: f32[16,128], index: 0, kind: input, shape index: {}]   ;;  %s211_s1 = inlined_call_operand.hbm [shape: f32[16,128], index: 1, kind: input, shape index: {}]   ;;  %s212_s2 = inlined_call_operand.hbm [shape: f32[1,1], index: 2, kind: output, shape index: {}]  }
   0x1   :  { %8 = vsyncpa [#allocation7], 0 }
   0x2   :  { %9 = vsyncpa [#allocation5], 0  ;;  %s154_s9 = smov [#allocation3]   ;;  %s94_s13 = scalar_lea.hbm %s210_s0, 256 }
   0x3   :  { %s15_s10 = sshll.u32 %s154_s9, 4  ;;  %p95_p0 = scmp.ne.s32.totalorder %s210_s0, %s94_s13  ;;  %s16_s10 = int_to_ptr.vmem [resolvable:$true] %s15_s10 }
   0x4   :  { %p98_p1 = scmp.lt.u32.totalorder %s94_s13, %s210_s0 }
   0x6   :  { %p100_p2 = pnand %p98_p1, %p95_p0 }
   0x8   :  { %103 = shalt.err (!%p100_p2)
}
   0x9   :  { %s104_s18 = scalar_lea.vmem %s16_s10, 256  ;;  %p109_p4 = scmp.lt.s32.totalorder %s16_s10, %s16_s10 }
   0xa   :  { %p105_p3 = scmp.ne.s32.totalorder %s16_s10, %s104_s18  ;;  %p110_p5 = scmp.lt.s32.totalorder %s104_s18, %s104_s18 }
   0xc   :  { %p111_p6 = por %p110_p5, %p109_p4 }
   0xe   :  { %p112_p7 = pnand %p111_p6, %p105_p3 }
  0x10   :  { %115 = shalt.err (!%p112_p7)
}
  0x11   :  { %s155_s19 = smov 128   ;;  %s156_s20 = smov 8  }
  0x12   :  { %21 = dma.hbm_to_vmem [thread:$0]  %s210_s0, 256, %s16_s10, [#allocation4], %s155_s19, %s155_s19, %s156_s20  }
  0x13   :  { %s157_s23 = smov [#allocation6]   ;;  %s116_s27 = scalar_lea.hbm %s211_s1, 256 }
  0x14   :  { %s27_s24 = sshll.u32 %s157_s23, 4  ;;  %p117_p8 = scmp.ne.s32.totalorder %s211_s1, %s116_s27  ;;  %s28_s24 = int_to_ptr.vmem [resolvable:$true] %s27_s24 }
  0x15   :  { %p120_p9 = scmp.lt.u32.totalorder %s116_s27, %s211_s1 }
  0x17   :  { %p122_p10 = pnand %p120_p9, %p117_p8 }
  0x19   :  { %125 = shalt.err (!%p122_p10)
}
  0x1a   :  { %s126_s4 = scalar_lea.vmem %s28_s24, 256  ;;  %p131_p12 = scmp.lt.s32.totalorder %s28_s24, %s28_s24 }
  0x1b   :  { %p127_p11 = scmp.ne.s32.totalorder %s28_s24, %s126_s4  ;;  %p132_p13 = scmp.lt.s32.totalorder %s126_s4, %s126_s4 }
  0x1d   :  { %p133_p0 = por %p132_p13, %p131_p12 }
  0x1f   :  { %p134_p1 = pnand %p133_p0, %p127_p11 }
  0x21   :  { %137 = shalt.err (!%p134_p1)
}
  0x22   :  { %33 = dma.hbm_to_vmem [thread:$0]  %s211_s1, 256, %s28_s24, [#allocation7], %s155_s19, %s155_s19, %s156_s20  }
  0x23   :  { %148 = dma.done.wait [#allocation4], 256  }
  0x24   :  { %149 = vsyncadd [#allocation4], 4294967040 }
  0x25   :  { %150 = dma.done.wait [#allocation7], 256  }
  0x26   :  { %151 = vsyncadd [#allocation7], 4294967040  ;;  %v45_v0 = vld [vmem:[#allocation3] sm:$0xff]  ;;  %v46_v1 = vld [vmem:[#allocation3 + $0x8] sm:$0xff]  ;;  %s138_s8 = scalar_lea.hbm %s212_s2, 16 }
  0x27   :  { %v47_v2 = vld [vmem:[#allocation6] sm:$0xff]  ;;  %v48_v3 = vld [vmem:[#allocation6 + $0x8] sm:$0xff]  ;;  %p139_p2 = scmp.ne.s32.totalorder %s212_s2, %s138_s8  ;;  %p142_p3 = scmp.lt.u32.totalorder %s138_s8, %s212_s2 }
  0x28   :  { %v49_v4 = vsub.f32 %v45_v0, %v47_v2  ;;  %v50_v5 = vsub.f32 %v46_v1, %v48_v3 }
  0x29   :  { %p144_p4 = pnand %p142_p3, %p139_p2 }
  0x2a   :  { %v52_v6 = vmul.f32 %v49_v4, %v49_v4  ;;  %v53_v7 = vmul.f32 %v50_v5, %v50_v5 }
  0x2c   :  { %v54_v8 = vadd.f32 %v53_v7, %v52_v6 }
  0x2e   :  { %61 = vadd.xlane.f32.xlu0 %v54_v8 }
  0xbb   :  { %v62_v9 = vpop.xlane.xlu0 %61 }
  0xbc   :  { %v63_v10 = vrot.slane %v62_v9, 4 }
  0xbe   :  { %v64_v11 = vadd.f32 %v63_v10, %v62_v9 }
  0xc0   :  { %v65_v12 = vrot.slane %v64_v11, 2 }
  0xc2   :  { %v66_v13 = vadd.f32 %v65_v12, %v64_v11 }
  0xc4   :  { %v67_v14 = vrot.slane %v66_v13, 1 }
  0xc6   :  { %v68_v15 = vadd.f32 %v67_v14, %v66_v13 }
  0xc8   :  { %87 = vpush %v68_v15 }
  0xf9   :  { %s88_s1 = spop %87 }
  0xfa   :  { %71 = sst [smem:[#allocation8]] %s88_s1 }
  0xfb   :  { %147 = shalt.err (!%p144_p4)
}
  0xfc   :  { %s158_s13 = smov [#allocation8]  }
  0xfd   :  { %79 = dma.smem_to_hbm %s158_s13, 16, %s212_s2, [#allocation5]  }
  0xfe   :  { %152 = dma.done.wait [#allocation5], 16  }
  0xff   :  { %153 = vsyncadd [#allocation5], 4294967280 }
 0x100   :  { %83 = sfence }
 0x101   :  { %84 = vsyncpa [#allocation4], 1 }
 0x102   :  { %85 = vsyncpa [#allocation7], 1 }
 0x103   :  { %86 = vsyncpa [#allocation5], 1 }

</bundles_post_ra>
